<compile_context>
chip_gen: v7x
topology: tpu7x:2x2x1
jax: 0.10.0
libtpu: 0.0.40
codegen_flags: <defaults>
</compile_context>

<pallas_src>
import math

import jax
import jax.numpy as jnp
from jax.experimental import pallas as pl
from jax.experimental.pallas import tpu as pltpu

_LANES = 128
# ~2 MiB per block => in+out, double-buffered ~= 8 MiB VMEM: safe on v5e's
# 16 MiB scoped default and well under v7x's 64 MiB physical VMEM.
_BLOCK_BYTES_TARGET = 2 * 1024 * 1024


def _copy_kernel(x_ref, o_ref):
    # Lane-dense full-tile copy: unmasked vector stores (Pallas masks only the
    # ragged last grid step, if any).
    o_ref[...] = x_ref[...]


def _sublane_unit(dtype) -> int:
    """Minimum row-alignment for dense sublane packing of this dtype."""
    itemsize = jnp.dtype(dtype).itemsize
    if itemsize >= 4:
        return 8
    return 8 * (4 // itemsize)  # 16 for bf16/f16, 32 for int8/fp8


def _pick_tile_rows(rows: int, dtype) -> int:
    """Row-tile from a byte budget, aligned to the dtype's sublane unit."""
    sub = _sublane_unit(dtype)
    if rows <= sub:
        return rows  # full-extent block is always a legal shape
    itemsize = jnp.dtype(dtype).itemsize
    cap = max(_BLOCK_BYTES_TARGET // (_LANES * itemsize), sub)
    tile = min(rows, cap)
    tile -= tile % sub
    return max(tile, sub)


def _pallas_identity_impl(x: jax.Array) -> jax.Array:
    orig_shape, orig_dtype = x.shape, x.dtype
    total = int(math.prod(orig_shape)) if orig_shape else 1
    if total == 0:
        # Nothing to copy; launching a kernel over an empty grid is pointless.
        return x

    # Flatten to a 128-lane-dense 2D slab.  Pad only to a multiple of 128
    # lanes (at most 127 elements), never to 8*128; the row axis is handled by
    # a cdiv grid, so no extra row padding pass is needed.
    flat = x.reshape((total,))
    pad = (-total) % _LANES
    if pad:
        flat = jnp.concatenate([flat, jnp.zeros((pad,), dtype=orig_dtype)])
    rows = (total + pad) // _LANES
    slab = flat.reshape((rows, _LANES))

    tile_rows = _pick_tile_rows(rows, orig_dtype)
    grid = (pl.cdiv(rows, tile_rows),)  # ragged last block handled by Pallas

    itemsize = jnp.dtype(orig_dtype).itemsize
    out = pl.pallas_call(
        _copy_kernel,
        out_shape=jax.ShapeDtypeStruct((rows, _LANES), orig_dtype),
        grid=grid,
        in_specs=[pl.BlockSpec((tile_rows, _LANES), lambda i: (i, 0))],
        out_specs=pl.BlockSpec((tile_rows, _LANES), lambda i: (i, 0)),
        # Pure identity: alias input buffer to output (no extra allocation).
        input_output_aliases={0: 0},
        cost_estimate=pl.CostEstimate(
            flops=0,
            transcendentals=0,
            bytes_accessed=2 * rows * _LANES * itemsize,
        ),
        compiler_params=pltpu.CompilerParams(
            dimension_semantics=("parallel",),
            vmem_limit_bytes=32 * 1024 * 1024,
        ),
    )(slab)

    if pad:
        out = out.reshape((total + pad,))[:total]
    return out.reshape(orig_shape)


# Jit the wrapper so the (tiny) pad/slice plumbing fuses around the kernel and
# the aliased intermediate slab can be donated cleanly.
pallas_identity = jax.jit(_pallas_identity_impl)


class WordEncoder:
    """JAX/Pallas port of the (empty) PyTorch WordEncoder module."""

    def __init__(self):
        # The PyTorch __init__ registers no parameters / submodules.
        pass

    def forward(self, x):
        # Reference forward body is `pass` -> returns None.  No kernel is
        # launched: discarded work would be pure overhead.
        # TODO(synk): reference forward is a no-op; no compute exists to translate.
        return None

    def __call__(self, x):
        return self.forward(x)


if __name__ == "__main__":
    key = jax.random.PRNGKey(0)
    k1, k2 = jax.random.split(key)

    # Small NCHW-style input consistent with an encoder-style module.
    x = jax.random.normal(k1, (2, 4, 16, 16), dtype=jnp.float32)

    # 1) Aligned f32 path (no padding, cdiv grid, aliased output).
    y = pallas_identity(x)
    jax.block_until_ready(y)
    assert y.shape == x.shape and y.dtype == x.dtype
    assert bool(jnp.all(y == x))

    # 2) Unaligned bf16 path (minimal lane pad + dtype-aware sublane unit).
    x_bf16 = jax.random.normal(k2, (3, 5, 7), dtype=jnp.float32).astype(jnp.bfloat16)
    y_bf16 = pallas_identity(x_bf16)
    jax.block_until_ready(y_bf16)
    assert y_bf16.shape == x_bf16.shape and y_bf16.dtype == x_bf16.dtype
    assert bool(jnp.all(y_bf16 == x_bf16))

    # Run the module exactly as PyTorch would: forward returns None and
    # launches nothing.
    enc = WordEncoder()
    out = enc(x)
    assert out is None

    print("KERNEL_OK")
</pallas_src>

<mosaic_0001>
module attributes {stable_mosaic.version = 11 : i64} {
  func.func @_copy_kernel(%arg0: i32, %arg1: memref<16x128xf32, #tpu.memory_space<vmem>>, %arg2: memref<16x128xf32, #tpu.memory_space<vmem>>) attributes {dimension_semantics = [#tpu.dimension_semantics<parallel>], iteration_bounds = array<i64: 1>, scalar_prefetch = 0 : i64, scratch_operands = 0 : i64, tpu.core_type = #tpu.core_type<tc>, window_params = [{transform_indices = @transform_0, window_bounds = array<i64: 16, 128>}, {transform_indices = @transform_1, window_bounds = array<i64: 16, 128>}]} {
    %c0 = arith.constant 0 : index
    %c0_0 = arith.constant 0 : index
    %0 = vector.load %arg1[%c0, %c0_0] : memref<16x128xf32, #tpu.memory_space<vmem>>, vector<16x128xf32>
    %c0_1 = arith.constant 0 : index
    %c0_2 = arith.constant 0 : index
    %1 = vector.load %arg2[%c0_1, %c0_2] : memref<16x128xf32, #tpu.memory_space<vmem>>, vector<16x128xf32>
    tpu.vector_store %arg2[%c0_1, %c0_2], %0 {strides = array<i32>} : memref<16x128xf32, #tpu.memory_space<vmem>>, vector<16x128xf32>,
    return
  }
  func.func @transform_0(%arg0: i32) -> (i32, i32) {
    %c0_i32 = arith.constant 0 : i32
    %c0_i32_0 = arith.constant 0 : i32
    return %arg0, %c0_i32 : i32, i32
  }
  func.func @transform_1(%arg0: i32) -> (i32, i32) {
    %c0_i32 = arith.constant 0 : i32
    %c0_i32_0 = arith.constant 0 : i32
    return %arg0, %c0_i32 : i32, i32
  }
}

</mosaic_0001>

<bundles_post_ra>
// kernel: _pallas_identity_impl.1
= control target key start
LH: loop header
LB: loop body
LE: loop exit
PB: predicated region body
PF: predicated region fallthrough
CT: control target
= control target key end

     0   :  { %s38_s0 = inlined_call_operand.vmem [shape: f32[16,128], index: 0, kind: input, shape index: {}, may-alias: {0,1}]   ;;  %s39_s1 = inlined_call_operand.vmem [shape: f32[16,128], index: 1, kind: output, shape index: {}, may-alias: {0,1}]  }
   0x1   :  { %v8_v0 = vld [vmem:[%s38_s0] sm:$0xff]  ;;  %v9_v1 = vld [vmem:[%s38_s0 + $0x8] sm:$0xff] }
   0x2   :  { %10 = vst [vmem:[%s39_s1] sm:$0xff] %v8_v0  ;;  %11 = vst [vmem:[%s39_s1 + $0x8] sm:$0xff] %v9_v1 }

</bundles_post_ra>
